<compile_context>
chip_gen: v5e
topology: v5e:2x2
jax: 0.10.0
libtpu: 0.0.40
codegen_flags: <defaults>
</compile_context>

<pallas_src>
import functools

import jax
import jax.numpy as jnp
from jax.experimental import pallas as pl
from jax.experimental.pallas import tpu as pltpu


# ----------------------------------------------------------------------------
# Fused kernel: per-batch circular-conv (im2col matmul) + APPNP propagation.
#   h  = W @ [Px | Pn] + b  ;  h1 = h[:, :M], h2 = h[:, M:]   # (N, Fd) each
#   a  = leakyrelu(h1 @ h2^T, 0.2)                            # (N, N)
#   s  = softmax(a, over axis 0)                              # torch Softmax(dim=1)
#   out = (1 - alpha) * (s @ h1) + alpha * h1
# ----------------------------------------------------------------------------
def _fused_kernel(p_ref, w_ref, b_ref, o_ref, *, alpha, m):
    w = w_ref[...]        # (O, K)
    bias = b_ref[...]     # (O, 1) — broadcasts over the lane axis

    # One lane-dense conv matmul produces both conv outputs: (O, 2M)
    h = jnp.dot(w, p_ref[...], preferred_element_type=jnp.float32) + bias
    h1 = h[:, :m]         # conv(x): (N, Fd), lane-aligned static slice
    h2 = h[:, m:]         # conv(n): (N, Fd)

    # a[n, m] = sum_f h1[n, f] * h2[m, f]   (einsum 'nf,mf->nm')
    a = jax.lax.dot_general(h1, h2, (((1,), (1,)), ((), ())),
                            preferred_element_type=jnp.float32)     # (N, N)
    a = jnp.where(a > 0, a, 0.2 * a)                                 # LeakyReLU(0.2)

    # softmax over torch dim=1 == axis 0 of the per-batch (N, M) matrix
    a = a - jnp.max(a, axis=0, keepdims=True)
    e = jnp.exp(a)
    s = e * pl.reciprocal(jnp.sum(e, axis=0, keepdims=True), approx=True)

    prop = jnp.dot(s, h1, preferred_element_type=jnp.float32)        # (N, Fd)
    o_ref[...] = (1.0 - alpha) * prop + alpha * h1


def graph_appnp_forward(x, n, weight, bias, stride, padding, alpha):
    """x, n: (B, C_in, H, W) NCHW; weight: (O, C_in, kh, kw); bias: (O,)."""
    B, C_in, H, W = x.shape
    O, _, kh, kw = weight.shape
    H_out = (H + 2 * padding - kh) // stride + 1
    W_out = (W + 2 * padding - kw) // stride + 1
    M = H_out * W_out
    K = C_in * kh * kw

    # Circular pad + im2col built in one pass, directly in (B, K, M) layout
    # (K ordering = (c, ky, kx) to match weight.reshape(O, K)); no transposes.
    def im2col(z):
        zp = jnp.pad(z, ((0, 0), (0, 0), (padding, padding), (padding, padding)),
                     mode="wrap")
        cols = [zp[:, :, ky:ky + stride * H_out:stride,
                          kx:kx + stride * W_out:stride]
                for ky in range(kh) for kx in range(kw)]   # each (B, C_in, Ho, Wo)
        p = jnp.stack(cols, axis=2)                        # (B, C_in, kh*kw, Ho, Wo)
        return p.reshape(B, K, M).astype(jnp.float32)

    # Both operands' patches side-by-side along the lane axis: (B, K, 2M)
    pxn = jnp.concatenate([im2col(x), im2col(n)], axis=2)
    w2 = weight.reshape(O, K).astype(jnp.float32)          # (O, K)
    b2 = bias.reshape(O, 1).astype(jnp.float32)            # (O, 1)

    out = pl.pallas_call(
        functools.partial(_fused_kernel, alpha=float(alpha), m=M),
        out_shape=jax.ShapeDtypeStruct((B, O, M), jnp.float32),
        grid=(B,),
        in_specs=[
            pl.BlockSpec((None, K, 2 * M), lambda b: (b, 0, 0)),  # per-batch patches
            pl.BlockSpec((O, K), lambda b: (0, 0)),               # weights (resident)
            pl.BlockSpec((O, 1), lambda b: (0, 0)),               # bias (resident)
        ],
        out_specs=pl.BlockSpec((None, O, M), lambda b: (b, 0, 0)),
        compiler_params=pltpu.CompilerParams(
            dimension_semantics=("parallel",)),
    )(pxn, w2, b2)

    # (B, O, M) is already (B, out_channels, H_out*W_out): just a reshape.
    return out.reshape(B, O, H_out, W_out)


# ----------------------------------------------------------------------------
# Pure-JAX reference (for correctness check only)
# ----------------------------------------------------------------------------
def _reference(x, n, weight, bias, stride, padding, alpha):
    def conv(z):
        zp = jnp.pad(z, ((0, 0), (0, 0), (padding, padding), (padding, padding)),
                     mode="wrap")
        y = jax.lax.conv_general_dilated(
            zp, weight, (stride, stride), "VALID",
            dimension_numbers=("NCHW", "OIHW", "NCHW"))
        return y + bias[None, :, None, None]

    h1, h2 = conv(x), conv(n)
    B, N, C, F = h1.shape
    xf = h1.reshape(B, N, C * F)
    nf = h2.reshape(B, N, C * F)
    a = jnp.einsum("bnf,bmf->bnm", xf, nf)
    a = jnp.where(a > 0, a, 0.2 * a)
    s = jax.nn.softmax(a, axis=1)
    prop = jnp.einsum("bnm,bmf->bnf", s, xf).reshape(B, N, C, F)
    return (1.0 - alpha) * prop + alpha * h1


if __name__ == "__main__":
    # Module hyperparameters (feat_len is unused in forward)
    in_channels, out_channels = 4, 8
    kernel_size, stride, padding = 3, 1, 1
    alpha = 0.9
    B, H, W = 2, 16, 16

    key = jax.random.PRNGKey(0)
    kx, kn, kw, kb = jax.random.split(key, 4)
    x = jax.random.normal(kx, (B, in_channels, H, W), dtype=jnp.float32)
    n = jax.random.normal(kn, (B, in_channels, H, W), dtype=jnp.float32)
    # Deterministic synthetic Conv2d parameters (shapes per nn.Conv2d)
    weight = 0.05 * jax.random.normal(
        kw, (out_channels, in_channels, kernel_size, kernel_size), dtype=jnp.float32)
    bias = 0.05 * jax.random.normal(kb, (out_channels,), dtype=jnp.float32)

    out = graph_appnp_forward(x, n, weight, bias, stride, padding, alpha)
    out = jax.block_until_ready(out)

    ref = jax.block_until_ready(_reference(x, n, weight, bias, stride, padding, alpha))
    assert out.shape == (B, out_channels, H, W)
    assert jnp.allclose(out, ref, rtol=1e-4, atol=1e-3), "mismatch vs reference"

    print("KERNEL_OK")
</pallas_src>

<mosaic_0001>
module attributes {stable_mosaic.version = 11 : i64} {
  func.func @_fused_kernel(%arg0: i32, %arg1: memref<1x36x512xf32, #tpu.memory_space<vmem>>, %arg2: memref<8x36xf32, #tpu.memory_space<vmem>>, %arg3: memref<8x1xf32, #tpu.memory_space<vmem>>, %arg4: memref<1x8x256xf32, #tpu.memory_space<vmem>>) attributes {dimension_semantics = [#tpu.dimension_semantics<parallel>], iteration_bounds = array<i64: 2>, scalar_prefetch = 0 : i64, scratch_operands = 0 : i64, tpu.core_type = #tpu.core_type<tc>, window_params = [{transform_indices = @transform_0, window_bounds = array<i64: 1, 36, 512>}, {pipeline_mode = #tpu.pipeline_mode<synchronous>, transform_indices = @transform_1, window_bounds = array<i64: 8, 36>}, {pipeline_mode = #tpu.pipeline_mode<synchronous>, transform_indices = @transform_2, window_bounds = array<i64: 8, 1>}, {transform_indices = @transform_3, window_bounds = array<i64: 1, 8, 256>}]} {
    %c0 = arith.constant 0 : index
    %c0_0 = arith.constant 0 : index
    %0 = vector.load %arg2[%c0, %c0_0] : memref<8x36xf32, #tpu.memory_space<vmem>>, vector<8x36xf32>
    %c0_1 = arith.constant 0 : index
    %c0_2 = arith.constant 0 : index
    %1 = vector.load %arg3[%c0_1, %c0_2] : memref<8x1xf32, #tpu.memory_space<vmem>>, vector<8x1xf32>
    %c0_3 = arith.constant 0 : index
    %c0_4 = arith.constant 0 : index
    %c0_5 = arith.constant 0 : index
    %2 = vector.load %arg1[%c0_3, %c0_4, %c0_5] : memref<1x36x512xf32, #tpu.memory_space<vmem>>, vector<1x36x512xf32>
    %3 = vector.shape_cast %2 : vector<1x36x512xf32> to vector<36x512xf32>
    %cst = arith.constant dense<0.000000e+00> : vector<8x512xf32>
    %4 = tpu.matmul %0, %3, %cst {dimension_numbers = #tpu.dot_dimension_numbers<[1], [0], [0], [1], [0, 0, 1, 1], [], []>} : vector<8x36xf32>, vector<36x512xf32>, vector<8x512xf32> -> vector<8x512xf32>
    %5 = vector.broadcast %1 : vector<8x1xf32> to vector<8x512xf32>
    %6 = arith.addf %4, %5 : vector<8x512xf32>
    %7 = vector.extract_strided_slice %6 {offsets = [0, 0], sizes = [8, 256], strides = [1, 1]} : vector<8x512xf32> to vector<8x256xf32>
    %8 = vector.extract_strided_slice %6 {offsets = [0, 256], sizes = [8, 256], strides = [1, 1]} : vector<8x512xf32> to vector<8x256xf32>
    %cst_6 = arith.constant dense<0.000000e+00> : vector<8x8xf32>
    %9 = tpu.matmul %7, %8, %cst_6 {dimension_numbers = #tpu.dot_dimension_numbers<[1], [1], [0], [0], [0, 0, 1, 0], [], []>} : vector<8x256xf32>, vector<8x256xf32>, vector<8x8xf32> -> vector<8x8xf32>
    %cst_7 = arith.constant 0.000000e+00 : f32
    %10 = vector.broadcast %cst_7 : f32 to vector<8x8xf32>
    %11 = arith.cmpf ogt, %9, %10 : vector<8x8xf32>
    %cst_8 = arith.constant 2.000000e-01 : f32
    %12 = vector.broadcast %cst_8 : f32 to vector<8x8xf32>
    %13 = arith.mulf %12, %9 : vector<8x8xf32>
    %14 = arith.select %11, %9, %13 : vector<8x8xi1>, vector<8x8xf32>
    %cst_9 = arith.constant dense<0xFF800000> : vector<8xf32>
    %15 = vector.multi_reduction <maximumf>, %14, %cst_9 [0] : vector<8x8xf32> to vector<8xf32>
    %16 = vector.shape_cast %15 : vector<8xf32> to vector<1x8xf32>
    %17 = vector.broadcast %16 : vector<1x8xf32> to vector<8x8xf32>
    %18 = arith.subf %14, %17 : vector<8x8xf32>
    %19 = math.exp %18 : vector<8x8xf32>
    %cst_10 = arith.constant dense<0.000000e+00> : vector<8xf32>
    %20 = vector.multi_reduction <add>, %19, %cst_10 [0] : vector<8x8xf32> to vector<8xf32>
    %21 = vector.shape_cast %20 : vector<8xf32> to vector<1x8xf32>
    %22 = tpu.reciprocal %21 {approx = true} : vector<1x8xf32> -> vector<1x8xf32>
    %23 = vector.broadcast %22 : vector<1x8xf32> to vector<8x8xf32>
    %24 = arith.mulf %19, %23 : vector<8x8xf32>
    %cst_11 = arith.constant dense<0.000000e+00> : vector<8x256xf32>
    %25 = tpu.matmul %24, %7, %cst_11 {dimension_numbers = #tpu.dot_dimension_numbers<[1], [0], [0], [1], [0, 0, 1, 1], [], []>} : vector<8x8xf32>, vector<8x256xf32>, vector<8x256xf32> -> vector<8x256xf32>
    %cst_12 = arith.constant 1.000000e-01 : f32
    %26 = vector.broadcast %cst_12 : f32 to vector<8x256xf32>
    %27 = arith.mulf %26, %25 : vector<8x256xf32>
    %cst_13 = arith.constant 0.899999976 : f32
    %28 = vector.broadcast %cst_13 : f32 to vector<8x256xf32>
    %29 = arith.mulf %28, %7 : vector<8x256xf32>
    %30 = arith.addf %27, %29 : vector<8x256xf32>
    %c0_14 = arith.constant 0 : index
    %c0_15 = arith.constant 0 : index
    %c0_16 = arith.constant 0 : index
    %31 = vector.load %arg4[%c0_14, %c0_15, %c0_16] : memref<1x8x256xf32, #tpu.memory_space<vmem>>, vector<1x8x256xf32>
    %32 = vector.shape_cast %31 : vector<1x8x256xf32> to vector<8x256xf32>
    %33 = vector.shape_cast %30 : vector<8x256xf32> to vector<1x8x256xf32>
    tpu.vector_store %arg4[%c0_14, %c0_15, %c0_16], %33 {strides = array<i32>} : memref<1x8x256xf32, #tpu.memory_space<vmem>>, vector<1x8x256xf32>,
    return
  }
  func.func @transform_0(%arg0: i32) -> (i32, i32, i32) {
    %c0_i32 = arith.constant 0 : i32
    %c0_i32_0 = arith.constant 0 : i32
    %c0_i32_1 = arith.constant 0 : i32
    return %arg0, %c0_i32, %c0_i32_0 : i32, i32, i32
  }
  func.func @transform_1(%arg0: i32) -> (i32, i32) {
    %c0_i32 = arith.constant 0 : i32
    %c0_i32_0 = arith.constant 0 : i32
    %c0_i32_1 = arith.constant 0 : i32
    return %c0_i32, %c0_i32_0 : i32, i32
  }
  func.func @transform_2(%arg0: i32) -> (i32, i32) {
    %c0_i32 = arith.constant 0 : i32
    %c0_i32_0 = arith.constant 0 : i32
    %c0_i32_1 = arith.constant 0 : i32
    return %c0_i32, %c0_i32_0 : i32, i32
  }
  func.func @transform_3(%arg0: i32) -> (i32, i32, i32) {
    %c0_i32 = arith.constant 0 : i32
    %c0_i32_0 = arith.constant 0 : i32
    %c0_i32_1 = arith.constant 0 : i32
    return %arg0, %c0_i32, %c0_i32_0 : i32, i32, i32
  }
}

</mosaic_0001>

<bundles_post_ra>
// kernel: tpu_custom_call.1
= control target key start
LH: loop header
LB: loop body
LE: loop exit
PB: predicated region body
PF: predicated region fallthrough
CT: control target
= control target key end

     0   :  { %8 = vsyncpa [#allocation3], 0  ;;  %s761_s0 = inlined_call_operand.vmem [shape: f32[2,36,512], index: 0, kind: input, shape index: {}]   ;;  %s762_s1 = inlined_call_operand.vmem [shape: f32[8,36], index: 1, kind: input, shape index: {}]   ;;  %s763_s2 = inlined_call_operand.vmem [shape: f32[8,1], index: 2, kind: input, shape index: {}]   ;;  %s764_s3 = inlined_call_operand.hbm [shape: f32[2,8,256], index: 3, kind: output, shape index: {}]  }
   0x1   :  { %10 = vsyncpa [#allocation3 + $0x1], 0  ;;  %s636_s12 = smov 0   ;;  %s638_s13 = smov 0  }
   0x2   :  { %s640_s14 = smov 0   ;;  %s642_s15 = smov 0  }
   0x3 LB: > { %s657_s16 = sadd.s32 4294967295, %s613_s15   ;;  %s483_s17 = sadd.s32 4294967294, %s613_s15   ;;  %s613_s15 = sphi %s642_s15, %s770_s15   ;;  %s609_s14 = sphi %s640_s14, %s769_s14   ;;  %s605_s13 = sphi %s638_s13, %s768_s13   ;;  %s601_s12 = sphi %s636_s12, %s767_s12  }
   0x4   : > { %s661_s18 = sadd.s32 1, %s613_s15   ;;  %s91_s19 = sadd.s32 1, %s609_s14 }
   0x5   : > { %s88_s20 = ssub.s32 %s613_s15, %s661_s18  ;;  %p101_p0 = scmp.ne.s32.totalorder %s609_s14, %s605_s13 }
   0x6   : > { %p89_p1 = scmp.eq.s32.totalorder %s88_s20, 0  ;;  %p102_p2 = scmp.eq.s32.totalorder %s657_s16, 1 }
   0x7   : > { %p107_p3 = scmp.ne.s32.totalorder %s605_s13, %s601_s12  ;;  %p108_p4 = scmp.eq.s32.totalorder %s483_s17, 1 }
   0x8   : > { %s672_s21 = scalar_select %p89_p1, %s609_s14, %s91_s19  }
   0x9   : > { %p674_p5 = por %p102_p2, %p101_p0  ;;  %p678_p6 = por %p108_p4, %p107_p3 }
   0xa   : > { %p486_p7 = scmp.ge.s32.totalorder %s613_s15, 1  ;;  %p140_p8 = scmp.lt.s32.totalorder %s613_s15, 3 }
   0xc   : > { %p141_p9 = pnand %p486_p7, %p140_p8 }
   0xd   : > { %p164_p10 = scmp.lt.s32.totalorder (!%p141_p9), %s657_s16, 1  ;;  %s161_s6 = sand.u32 (!%p141_p9), 1, %s605_s13  }
   0xe   : > { %144 = sbr.rel (%p141_p9) target bundleno = 488 (0x1e8), region = 32  ;;  %s487_s7 = sshll.u32 (!%p141_p9), %s161_s6, 4 }
   0xf   : > { %s504_s8 = sshll.u32 (!%p141_p9), %s657_s16, 4  ;;  %s163_s17 = scalar_lea.vmem (!%p141_p9), [#allocation2], %s487_s7 }
  0x10   : > { %s419_s11 = scalar_lea.hbm (!%p141_p9), %s764_s3, %s504_s8  ;;  %s421_s19 = sshll.u32 (!%p141_p9), %s163_s17, 4  ;;  %s422_s19 = int_to_ptr.vmem [resolvable:$true] %s421_s19 }
  0x11   : > { %s423_s20 = sshll.u32 (!%p141_p9), %s419_s11, 4  ;;  %s571_s28 = scalar_lea.hbm (!%p141_p9), %s764_s3, 32  ;;  %s424_s20 = int_to_ptr.hbm [resolvable:$true] %s423_s20 }
  0x12   : > { %s565_s24 = sshra.s32 (!%p141_p9), %s424_s20, 4  ;;  %s566_s24 = int_to_ptr.hbm [resolvable:$true] %s565_s24 }
  0x13   : > { %v170_v0 = vld [vmem:[%s763_s2] sm:$0xff]  ;;  %v615_v1 = vmov 0   ;;  %s165_s26 = scalar_select %p164_p10, %s657_s16, 1  ;;  %vm200_vm0 = vcmask 1043456   ;;  %vm196_vm1 = vcmask 293888   ;;  %vm336_vm3 = vcmask 64512  }
  0x14   : > { %546 = vset.pattern.permute.xlu0 %v615_v1  ;;  %v169_v18 = vld [vmem:[%s762_s1] sm:$0xff]  ;;  %s408_s16 = scalar_lea.sflag [#allocation3], %s161_s6  ;;  %s567_s25 = scalar_lea.hbm %s566_s24, 16 }
  0x15   : > { %193 = vperm.xlu0 %546, %v170_v0   ;;  %s505_s27 = smul.u32 160, %s165_s26  ;;  %p568_p11 = scmp.ne.s32.totalorder %s566_s24, %s567_s25 }
  0x16   : > { %p572_p0 = scmp.lt.s32.totalorder %s566_s24, %s764_s3  ;;  %p573_p1 = scmp.lt.s32.totalorder %s571_s28, %s567_s25 }
  0x17   : > { %s692_s30 = scalar_lea.vmem %s761_s0, %s505_s27  ;;  %p569_p12 = pnand %p568_p11, %p674_p5 }
  0x18   : > { %v189_v2 = vld [vmem:[%s692_s30 + $0x90] sm:$0xf]  ;;  %v190_v3 = vld [vmem:[%s692_s30 + $0x98] sm:$0xf]  ;;  %v187_v8 = vld [vmem:[%s692_s30 + $0x80] sm:$0xf]  ;;  %p574_p2 = por %p573_p1, %p572_p0 }
  0x19   : > { %v185_v4 = vld [vmem:[%s692_s30 + $0x70] sm:$0xff]  ;;  %493 = vmatpush.msk.msra.mxu2 %vm200_vm0, %v189_v2  ;;  %495 = vmatpush.msk.msra.mxu3 %vm200_vm0, %v190_v3  ;;  %v186_v5 = vld [vmem:[%s692_s30 + $0x78] sm:$0xff]  ;;  %v188_v9 = vld [vmem:[%s692_s30 + $0x88] sm:$0xf]  ;;  %p570_p13 = pneg %p569_p12 }
  0x1a   : > { %v181_v6 = vld [vmem:[%s692_s30 + $0x50] sm:$0xff]  ;;  %v182_v7 = vld [vmem:[%s692_s30 + $0x58] sm:$0xff]  ;;  %v183_v10 = vld [vmem:[%s692_s30 + $0x60] sm:$0xff]  ;;  %489 = vmatpush.msk.msra.mxu0 %vm200_vm0, %v187_v8  ;;  %491 = vmatpush.msk.msra.mxu1 %vm200_vm0, %v188_v9 }
  0x1b   : > { %265 = vmatpush.msra.mxu2 %v185_v4  ;;  %285 = vmatpush.msra.mxu3 %v186_v5  ;;  %v184_v11 = vld [vmem:[%s692_s30 + $0x68] sm:$0xff]  ;;  %v177_v12 = vld [vmem:[%s692_s30 + $0x30] sm:$0xff]  ;;  %v178_v13 = vld [vmem:[%s692_s30 + $0x38] sm:$0xff]  ;;  %p575_p3 = pnand %p574_p2, %p570_p13 }
  0x1c   : > { %v179_v14 = vld [vmem:[%s692_s30 + $0x40] sm:$0xff]  ;;  %v180_v15 = vld [vmem:[%s692_s30 + $0x48] sm:$0xff]  ;;  %225 = vmatpush.msra.mxu0 %v183_v10  ;;  %245 = vmatpush.msra.mxu1 %v184_v11  ;;  %v173_v16 = vld [vmem:[%s692_s30 + $0x10] sm:$0xff] }
  0x1d   : > { %266 = vmatpush.msra.mxu2 %v181_v6  ;;  %286 = vmatpush.msra.mxu3 %v182_v7  ;;  %v174_v17 = vld [vmem:[%s692_s30 + $0x18] sm:$0xff]  ;;  %v175_v19 = vld [vmem:[%s692_s30 + $0x20] sm:$0xff]  ;;  %v176_v20 = vld [vmem:[%s692_s30 + $0x28] sm:$0xff] }
  0x1e   : > { %226 = vmatpush.msra.mxu0 %v179_v14  ;;  %246 = vmatpush.msra.mxu1 %v180_v15  ;;  %v171_v21 = vld [vmem:[%s692_s30] sm:$0xff]  ;;  %v172_v22 = vld [vmem:[%s692_s30 + $0x8] sm:$0xff] }
  0x1f   : > { %267 = vmatpush.msra.mxu2 %v177_v12  ;;  %287 = vmatpush.msra.mxu3 %v178_v13 }
  0x20   : > { %227 = vmatpush.msra.mxu0 %v175_v19  ;;  %247 = vmatpush.msra.mxu1 %v176_v20 }
  0x21   : > { %268 = vmatpush.msra.mxu2 %v173_v16  ;;  %288 = vmatpush.msra.mxu3 %v174_v17 }
  0x22   : > { %494 = vmatmul.msk.f32.vlgmr.msra.gmra.mxu2 %vm196_vm1, %v169_v18  ;;  %496 = vmatmul.msk.f32.vlgmr.msra.gmra.mxu3 %vm196_vm1, %v169_v18 }
  0x23   : > { %228 = vmatpush.msra.mxu0 %v171_v21  ;;  %248 = vmatpush.msra.mxu1 %v172_v22 }
  0x24   : > { %490 = vmatmul.msk.f32.vlgmr.msra.gmra.mxu0 %vm196_vm1, %v169_v18  ;;  %492 = vmatmul.msk.f32.vlgmr.msra.gmra.mxu1 %vm196_vm1, %v169_v18 }
  0x87   : > { %v194_v23 = vpop.permute.xlu0 %193 }
  0xa1   : > { %v230_v24 = vpop.f32.mrf.mxu0  ;;  %v250_v25 = vpop.f32.mrf.mxu1 }
  0xa2   : > { %v231_v26 = vadd.f32 %v230_v24, %v194_v23  ;;  %v251_v27 = vadd.f32 %v250_v25, %v194_v23 }
  0xa4   : > { %374 = vmatpush.msrb.mxu2 %v231_v26  ;;  %394 = vmatpush.msrb.mxu3 %v251_v27  ;;  %v401_v57 = vmul.f32 0.9, %v231_v26  ;;  %v402_v59 = vmul.f32 0.9, %v251_v27 }
  0xa5   : > { %v270_v28 = vpop.f32.mrf.mxu2  ;;  %v290_v29 = vpop.f32.mrf.mxu3 }
  0xa6   : > { %v271_v30 = vadd.f32 %v270_v28, %v194_v23  ;;  %v291_v31 = vadd.f32 %v290_v29, %v194_v23 }
  0xa8   : > { %308 = vmatpush.xpose.msrb.mxu0 %v271_v30  ;;  %328 = vmatpush.xpose.msrb.mxu1 %v291_v31 }
  0xab   : > { %309 = vmatmul.f32.vlgmr.msrb.gmra.mxu0 %v231_v26  ;;  %329 = vmatmul.f32.vlgmr.msrb.gmra.mxu1 %v251_v27 }
 0x128   : > { %v310_v32 = vpop.f32.mrf.mxu0  ;;  %v330_v33 = vpop.f32.mrf.mxu1 }
 0x129   : > { %v331_v34 = vadd.f32 %v330_v33, %v310_v32 }
 0x12b   : > { %vm333_vm2 = vcmp.gt.f32.partialorder %v331_v34, 0.0  ;;  %v334_v35 = vmul.f32 0.2, %v331_v34 }
 0x12d   : > { %v335_v36 = vsel %vm333_vm2, %v331_v34, %v334_v35 }
 0x12e   : > { %v337_v37 = vsel %vm336_vm3, %v335_v36, -inf }
 0x12f   : > { %v338_v38 = vrot.slane %v337_v37, 4 }
 0x131   : > { %v339_v39 = vmax.f32 %v337_v37, %v338_v38 }
 0x133   : > { %v340_v40 = vrot.slane %v339_v39, 2 }
 0x135   : > { %v341_v41 = vmax.f32 %v339_v39, %v340_v40 }
 0x137   : > { %v342_v42 = vrot.slane %v341_v41, 1 }
 0x139   : > { %v343_v43 = vmax.f32 %v341_v41, %v342_v42 }
 0x13b   : > { %v344_v44 = vsub.f32 %v335_v36, %v343_v43 }
 0x13d   : > { %v345_v45 = vmul.f32 1.442695, %v344_v44 }
 0x13f   : > { %547 = vpow2.f32 %v345_v45 }
 0x145   : > { %v548_v46 = vpop.eup %547 }
 0x146   : > { %v347_v47 = vsel %vm336_vm3, %v548_v46, 0.0 }
 0x147   : > { %v348_v48 = vrot.slane %v347_v47, 4 }
 0x149   : > { %v349_v49 = vadd.f32 %v348_v48, %v347_v47 }
 0x14b   : > { %v350_v50 = vrot.slane %v349_v49, 2 }
 0x14d   : > { %v351_v51 = vadd.f32 %v350_v50, %v349_v49 }
 0x14f   : > { %v352_v52 = vrot.slane %v351_v51, 1 }
 0x151   : > { %v353_v53 = vadd.f32 %v352_v52, %v351_v51 }
 0x153   : > { %549 = vrcp.f32 %v353_v53 }
 0x159   : > { %v550_v54 = vpop.eup %549 }
 0x15a   : > { %v355_v55 = vmul.f32 %v550_v54, %v548_v46 }
 0x15c   : > { %497 = vmatmul.msk.f32.vlgmr.msrb.gmra.mxu2 %vm336_vm3, %v355_v55  ;;  %498 = vmatmul.msk.f32.vlgmr.msrb.gmra.mxu3 %vm336_vm3, %v355_v55 }
 0x1df   : > { %v376_v56 = vpop.f32.mrf.mxu2  ;;  %v396_v58 = vpop.f32.mrf.mxu3 }
 0x1e0   : > { %v399_v60 = vmul.f32 0.1, %v376_v56  ;;  %v400_v61 = vmul.f32 0.1, %v396_v58 }
 0x1e2   : > { %v403_v62 = vadd.f32 %v401_v57, %v399_v60  ;;  %v404_v63 = vadd.f32 %v402_v59, %v400_v61 }
 0x1e4   : > { %405 = vst [vmem:[%s163_s17] sm:$0xff] %v403_v62 }
 0x1e5   : > { %406 = vst [vmem:[%s163_s17 + $0x8] sm:$0xff] %v404_v63 }
 0x1e6   : > { %578 = shalt.err (!%p575_p3)
}
 0x1e7   : > { %506 = dma.vmem_to_hbm [thread:$0]  (%p674_p5), %s422_s19, 256, %s424_s20, %s408_s16  }
 0x1e8 PF: > { %p512_p4 = scmp.ge.s32.totalorder %s613_s15, 2  ;;  %s435_s4 = sand.u32 1, %s601_s12  }
 0x1e9   : > { %s436_s5 = scalar_lea.sflag [#allocation3], %s435_s4 }
 0x1ea   : > { %p509_p7 = pnand %p512_p4, %p678_p6 }
 0x1ec   : > { %p510_p8 = pneg %p509_p7 }
 0x1ee   : > { %596 = dma.done.wait (%p510_p8), %s436_s5, 256  }
 0x1ef   : > { %598 = vsyncadd (%p510_p8), %s436_s5, 4294967040  ;;  %p13_p9 = scmp.ge.s32.totalorder %s661_s18, 4   ;;  %s767_s12 = smov %s605_s13 }
 0x1f0   : > { %s768_s13 = smov %s609_s14  ;;  %s769_s14 = smov %s672_s21 }
 0x1f1   : > { %s770_s15 = smov %s661_s18  ;;  %15 = sbr.rel (!%p13_p9) target bundleno = 3 (0x3), region = 67 }
 0x1f6   :  { %442 = vsyncpa [#allocation3], 1 }
 0x1f7   :  { %444 = vsyncpa [#allocation3 + $0x1], 1 }

</bundles_post_ra>
